<compile_context>
chip_gen: v7x
topology: tpu7x:2x2x1
jax: 0.10.0
libtpu: 0.0.40
codegen_flags: <defaults>
</compile_context>

<pallas_src>
import functools

import jax
import jax.numpy as jnp
from jax.experimental import pallas as pl
from jax.experimental.pallas import tpu as pltpu


def _round_up(n, m):
    return ((n + m - 1) // m) * m


def _vmem_budget_bytes():
    """Per-core VMEM budget with headroom for Mosaic scratch/semaphores."""
    try:
        cap = int(pltpu.get_tpu_info().vmem_capacity_bytes)
    except Exception:
        cap = 64 * 1024 * 1024  # conservative fallback (v7x-sized)
    # ~80% of physical: ~51 MiB on v7x (64 MiB), ~102 MiB on v5e/v6e (128 MiB).
    return min(int(cap * 0.8), 112 * 1024 * 1024)


def _self_gating_kernel(x_ref, w_ref, b_ref, o_ref):
    # Resident-W path.
    # x_ref: (TM, D) f32 ; w_ref: (D, D) bf16, (in, out) layout ;
    # b_ref: (1, D) f32  ; o_ref: (TM, D)
    z = jnp.dot(
        x_ref[...].astype(jnp.bfloat16),
        w_ref[...],
        preferred_element_type=jnp.float32,
    ) + b_ref[...]
    gate = pl.reciprocal(1.0 + jnp.exp(-z), approx=True)  # sigmoid on EUP
    o_ref[...] = (x_ref[...] * gate).astype(o_ref.dtype)


def _self_gating_kernel_coltiled(x_ref, w_ref, b_ref, o_ref):
    # Column-tiled W path (huge D).
    # x_ref: (TM, D) f32 full width ; w_ref: (D, TN) bf16 ;
    # b_ref: (1, TN) f32 ; o_ref: (TM, TN)
    tn = o_ref.shape[1]
    z = jnp.dot(
        x_ref[...].astype(jnp.bfloat16),
        w_ref[...],
        preferred_element_type=jnp.float32,
    ) + b_ref[...]
    gate = pl.reciprocal(1.0 + jnp.exp(-z), approx=True)
    col0 = pl.multiple_of(pl.program_id(1) * tn, tn)
    o_ref[...] = (x_ref[:, pl.ds(col0, tn)] * gate).astype(o_ref.dtype)


@functools.partial(jax.jit, static_argnames=("tm", "tn"))
def self_gating(x, w, b, *, tm=None, tn=None):
    """x: (B, S, D) f32; w: (D, D) nn.Linear (out, in) layout; b: (D,)."""
    B, S, D = x.shape
    M = B * S

    x2 = x.reshape(M, D)
    w_t = w.T.astype(jnp.bfloat16)        # (in, out): MXU-native, half the bytes
    b2 = b.reshape(1, D).astype(jnp.float32)

    budget = _vmem_budget_bytes()

    # ---- choose output-column tile width tn ----
    if tn is None:
        if 2 * D * D <= min(budget // 3, 24 * 1024 * 1024):
            tn = D                         # resident-W fast path
        else:
            tn = 256 if D % 256 == 0 else 128
    assert D % tn == 0 and (tn == D or tn % 128 == 0)

    # ---- choose row tile tm to fill the VMEM budget ----
    if tn == D:
        w_vmem = 2 * D * D                 # single-buffered bf16 W
    else:
        w_vmem = 2 * (2 * D * tn)          # double-buffered bf16 W column tile
    per_row = 4 * (2 * D + 2 * tn)         # x + out, f32, double-buffered
    if tm is None:
        avail = budget - w_vmem - 2 * 1024 * 1024
        tm = max(8, min(1024, avail // per_row))
    tm = min(tm, _round_up(M, 8))
    tm = max(8, (tm // 8) * 8)             # keep sublane multiple of 8

    est = per_row * tm + w_vmem + 8 * D
    vmem_limit = int(min(max(2 * est, 32 * 1024 * 1024), budget))

    grid_m = pl.cdiv(M, tm)                # no pad / slice copies

    if tn == D:
        out2 = pl.pallas_call(
            _self_gating_kernel,
            out_shape=jax.ShapeDtypeStruct((M, D), x.dtype),
            grid_spec=pltpu.PrefetchScalarGridSpec(
                num_scalar_prefetch=0,
                grid=(grid_m,),
                in_specs=[
                    # x row tile, streamed (double-buffered by default)
                    pl.BlockSpec((tm, D), lambda i: (i, 0)),
                    # resident bf16 weight: constant block -> single buffer
                    pl.BlockSpec((D, D), lambda i: (0, 0),
                                 pipeline_mode=pl.Buffered(1)),
                    pl.BlockSpec((1, D), lambda i: (0, 0),
                                 pipeline_mode=pl.Buffered(1)),
                ],
                out_specs=pl.BlockSpec((tm, D), lambda i: (i, 0)),
            ),
            compiler_params=pltpu.CompilerParams(
                dimension_semantics=("parallel",),
                vmem_limit_bytes=vmem_limit,
            ),
        )(x2, w_t, b2)
    else:
        # Huge-D path: columns are the inner axis so the full-width x tile is
        # fetched once per row tile; W column tiles stream (default 2 buffers).
        out2 = pl.pallas_call(
            _self_gating_kernel_coltiled,
            out_shape=jax.ShapeDtypeStruct((M, D), x.dtype),
            grid_spec=pltpu.PrefetchScalarGridSpec(
                num_scalar_prefetch=0,
                grid=(grid_m, D // tn),
                in_specs=[
                    pl.BlockSpec((tm, D), lambda i, j: (i, 0)),
                    pl.BlockSpec((D, tn), lambda i, j: (0, j)),
                    pl.BlockSpec((1, tn), lambda i, j: (0, j)),
                ],
                out_specs=pl.BlockSpec((tm, tn), lambda i, j: (i, j)),
            ),
            compiler_params=pltpu.CompilerParams(
                dimension_semantics=("parallel", "arbitrary"),
                vmem_limit_bytes=vmem_limit,
            ),
        )(x2, w_t, b2)

    return out2.reshape(B, S, D)


def self_gating_ref_f32(x, w, b):
    z = jnp.einsum("bsd,od->bso", x, w) + b
    return x * jax.nn.sigmoid(z)


def self_gating_ref_bf16(x, w, b):
    # Matches the kernel's bf16 MXU operands (f32 accumulate, f32 gating math).
    B, S, D = x.shape
    z = jnp.dot(
        x.reshape(-1, D).astype(jnp.bfloat16),
        w.T.astype(jnp.bfloat16),
        preferred_element_type=jnp.float32,
    ).reshape(B, S, D) + b
    return x * jax.nn.sigmoid(z)


if __name__ == "__main__":
    key = jax.random.PRNGKey(0)
    B, S, D = 2, 8, 128  # d_model = 128

    kx, kw, kb = jax.random.split(key, 3)
    x = jax.random.normal(kx, (B, S, D), dtype=jnp.float32)

    # Deterministic params mimicking nn.Linear default init U[-1/sqrt(D), 1/sqrt(D)]
    bound = 1.0 / jnp.sqrt(jnp.float32(D))
    w = jax.random.uniform(kw, (D, D), minval=-bound, maxval=bound, dtype=jnp.float32)
    b = jax.random.uniform(kb, (D,), minval=-bound, maxval=bound, dtype=jnp.float32)

    out = self_gating(x, w, b)
    out = jax.block_until_ready(out)

    ref16 = self_gating_ref_bf16(x, w, b)   # same bf16 matmul operands as kernel
    ref32 = self_gating_ref_f32(x, w, b)    # full-precision reference
    assert jnp.allclose(out, ref16, atol=2e-2, rtol=2e-2), "mismatch vs bf16 reference"
    assert jnp.allclose(out, ref32, atol=1e-1, rtol=1e-1), "mismatch vs f32 reference"

    print("KERNEL_OK")
</pallas_src>

<mosaic_0001>
module attributes {stable_mosaic.version = 11 : i64} {
  func.func @_self_gating_kernel(%arg0: i32, %arg1: memref<16x128xf32, #tpu.memory_space<vmem>>, %arg2: memref<128x128xbf16, #tpu.memory_space<vmem>>, %arg3: memref<1x128xf32, #tpu.memory_space<vmem>>, %arg4: memref<16x128xf32, #tpu.memory_space<vmem>>) attributes {dimension_semantics = [#tpu.dimension_semantics<parallel>], iteration_bounds = array<i64: 1>, scalar_prefetch = 0 : i64, scratch_operands = 0 : i64, tpu.core_type = #tpu.core_type<tc>, window_params = [{transform_indices = @transform_0, window_bounds = array<i64: 16, 128>}, {pipeline_mode = #tpu.pipeline_mode<synchronous>, transform_indices = @transform_1, window_bounds = array<i64: 128, 128>}, {pipeline_mode = #tpu.pipeline_mode<synchronous>, transform_indices = @transform_2, window_bounds = array<i64: 1, 128>}, {transform_indices = @transform_3, window_bounds = array<i64: 16, 128>}]} {
    %c0 = arith.constant 0 : index
    %c0_0 = arith.constant 0 : index
    %0 = vector.load %arg1[%c0, %c0_0] : memref<16x128xf32, #tpu.memory_space<vmem>>, vector<16x128xf32>
    %1 = arith.truncf %0 : vector<16x128xf32> to vector<16x128xbf16>
    %c0_1 = arith.constant 0 : index
    %c0_2 = arith.constant 0 : index
    %2 = vector.load %arg2[%c0_1, %c0_2] : memref<128x128xbf16, #tpu.memory_space<vmem>>, vector<128x128xbf16>
    %cst = arith.constant dense<0.000000e+00> : vector<16x128xf32>
    %3 = tpu.matmul %1, %2, %cst {dimension_numbers = #tpu.dot_dimension_numbers<[1], [0], [0], [1], [0, 0, 1, 1], [], []>} : vector<16x128xbf16>, vector<128x128xbf16>, vector<16x128xf32> -> vector<16x128xf32>
    %c0_3 = arith.constant 0 : index
    %c0_4 = arith.constant 0 : index
    %4 = vector.load %arg3[%c0_3, %c0_4] : memref<1x128xf32, #tpu.memory_space<vmem>>, vector<1x128xf32>
    %5 = vector.broadcast %4 : vector<1x128xf32> to vector<16x128xf32>
    %6 = arith.addf %3, %5 : vector<16x128xf32>
    %cst_5 = arith.constant 0.000000e+00 : f32
    %7 = vector.broadcast %cst_5 : f32 to vector<16x128xf32>
    %8 = arith.subf %7, %6 : vector<16x128xf32>
    %9 = math.exp %8 : vector<16x128xf32>
    %cst_6 = arith.constant 1.000000e+00 : f32
    %10 = vector.broadcast %cst_6 : f32 to vector<16x128xf32>
    %11 = arith.addf %10, %9 : vector<16x128xf32>
    %12 = tpu.reciprocal %11 {approx = true} : vector<16x128xf32> -> vector<16x128xf32>
    %c0_7 = arith.constant 0 : index
    %c0_8 = arith.constant 0 : index
    %13 = vector.load %arg1[%c0_7, %c0_8] : memref<16x128xf32, #tpu.memory_space<vmem>>, vector<16x128xf32>
    %14 = arith.mulf %13, %12 : vector<16x128xf32>
    %c0_9 = arith.constant 0 : index
    %c0_10 = arith.constant 0 : index
    %15 = vector.load %arg4[%c0_9, %c0_10] : memref<16x128xf32, #tpu.memory_space<vmem>>, vector<16x128xf32>
    tpu.vector_store %arg4[%c0_9, %c0_10], %14 {strides = array<i32>} : memref<16x128xf32, #tpu.memory_space<vmem>>, vector<16x128xf32>,
    return
  }
  func.func @transform_0(%arg0: i32) -> (i32, i32) {
    %c0_i32 = arith.constant 0 : i32
    %c0_i32_0 = arith.constant 0 : i32
    return %arg0, %c0_i32 : i32, i32
  }
  func.func @transform_1(%arg0: i32) -> (i32, i32) {
    %c0_i32 = arith.constant 0 : i32
    %c0_i32_0 = arith.constant 0 : i32
    %c0_i32_1 = arith.constant 0 : i32
    return %c0_i32, %c0_i32_0 : i32, i32
  }
  func.func @transform_2(%arg0: i32) -> (i32, i32) {
    %c0_i32 = arith.constant 0 : i32
    %c0_i32_0 = arith.constant 0 : i32
    %c0_i32_1 = arith.constant 0 : i32
    return %c0_i32, %c0_i32_0 : i32, i32
  }
  func.func @transform_3(%arg0: i32) -> (i32, i32) {
    %c0_i32 = arith.constant 0 : i32
    %c0_i32_0 = arith.constant 0 : i32
    return %arg0, %c0_i32 : i32, i32
  }
}

</mosaic_0001>

<bundles_post_ra>
// kernel: self_gating.1
= control target key start
LH: loop header
LB: loop body
LE: loop exit
PB: predicated region body
PF: predicated region fallthrough
CT: control target
= control target key end

     0   :  { %v244_v1 = vmov 0.0   ;;  %vm245_vm0 = vmmov 0   ;;  %s314_s0 = inlined_call_operand.vmem [shape: f32[16,128], index: 0, kind: input, shape index: {}]   ;;  %s315_s1 = inlined_call_operand.vmem [shape: bf16[128,128], index: 1, kind: input, shape index: {}]   ;;  %s316_s2 = inlined_call_operand.vmem [shape: f32[1,128], index: 2, kind: input, shape index: {}]   ;;  %s317_s3 = inlined_call_operand.hbm [shape: f32[16,128], index: 3, kind: output, shape index: {}]  }
   0x1   :  { %v204_v0 = vld [vmem:[%s315_s1] sm:$0xff]   ;;  %179 = vmatprep.subr.bf16.mxu0 %v244_v1  ;;  %v205_v2 = vld [vmem:[%s315_s1 + $0x8] sm:$0xff]   ;;  %195 = vmatprep.mubr.msk.bf16.mxu0 %vm245_vm0, %v244_v1  ;;  %v206_v3 = vld [vmem:[%s315_s1 + $0x10] sm:$0xff]  }
   0x2   :  { %180 = vmatpush3.bf16.msra.mxu0 %v204_v0 }
   0x3   :  { %181 = vmatprep.subr.bf16.mxu0 %v244_v1 }
   0x6   :  { %182 = vmatpush3.bf16.msra.mxu0 %v205_v2 }
   0x7   :  { %183 = vmatprep.subr.bf16.mxu0 %v244_v1 }
   0x8   :  { %8 = vsyncpa [#allocation3], 0  ;;  %v207_v4 = vld [vmem:[%s315_s1 + $0x18] sm:$0xff]   ;;  %v208_v5 = vld [vmem:[%s315_s1 + $0x20] sm:$0xff]  }
   0x9   :  { %v209_v6 = vld [vmem:[%s315_s1 + $0x28] sm:$0xff]   ;;  %v210_v7 = vld [vmem:[%s315_s1 + $0x30] sm:$0xff]   ;;  %v211_v8 = vld [vmem:[%s315_s1 + $0x38] sm:$0xff]  }
   0xa   :  { %184 = vmatpush3.bf16.msra.mxu0 %v206_v3  ;;  %v16_v9 = vld [vmem:[%s314_s0] sm:$0xff]  ;;  %v17_v10 = vld [vmem:[%s314_s0 + $0x8] sm:$0xff]  ;;  %s246_s0 = smov [#allocation2]  }
   0xb   :  { %185 = vmatprep.subr.bf16.mxu0 %v244_v1  ;;  %v18_v11 = vpack.c.bf16 %v17_v10, %v16_v9  ;;  %v161_v12 = vld [vmem:[%s316_s2] ss:$0 sm:$0xff]  ;;  %s150_s1 = sshll.u32 %s246_s0, 4  ;;  %s151_s1 = int_to_ptr.vmem [resolvable:$true] %s150_s1 }
   0xc   :  { %s220_s2 = scalar_lea.vmem %s151_s1, 256  ;;  %p225_p1 = scmp.lt.s32.totalorder %s151_s1, %s151_s1 }
   0xd   :  { %p221_p0 = scmp.ne.s32.totalorder %s151_s1, %s220_s2  ;;  %p226_p2 = scmp.lt.s32.totalorder %s220_s2, %s220_s2 }
   0xe   :  { %186 = vmatpush3.bf16.msra.mxu0 %v207_v4 }
   0xf   :  { %187 = vmatprep.subr.bf16.mxu0 %v244_v1  ;;  %p227_p3 = por %p226_p2, %p225_p1 }
  0x11   :  { %p228_p4 = pnand %p227_p3, %p221_p0 }
  0x12   :  { %188 = vmatpush3.bf16.msra.mxu0 %v208_v5 }
  0x13   :  { %189 = vmatprep.subr.bf16.mxu0 %v244_v1 }
  0x16   :  { %190 = vmatpush3.bf16.msra.mxu0 %v209_v6 }
  0x17   :  { %191 = vmatprep.subr.bf16.mxu0 %v244_v1 }
  0x1a   :  { %192 = vmatpush3.bf16.msra.mxu0 %v210_v7 }
  0x1b   :  { %193 = vmatprep.subr.bf16.mxu0 %v244_v1 }
  0x1e   :  { %194 = vmatpush3.bf16.msra.mxu0 %v211_v8 }
  0x21   :  { %196 = vmatmul.mubr.bf16.vlgmr.msra.gmra.mrb[0].mxu0 %v18_v11 }
  0xf4   :  { %v124_v13 = vpop.f32.mrb[0].mxu0 }
  0xf5   :  { %v125_v14 = vadd.f32 %v161_v12, %v124_v13  ;;  %v197_v15 = vpop.f32.mrb[1].mxu0 }
  0xf6   :  { %v127_v16 = vpop.f32.mrb[2].mxu0 }
  0xf7   :  { %v131_v17 = vsub.f32 0.0, %v125_v14  ;;  %v128_v18 = vadd.f32 %v161_v12, %v127_v16  ;;  %v198_v19 = vpop.f32.mrb[3].mxu0 }
  0xf9   :  { %v133_v20 = vmul.f32 1.442695, %v131_v17  ;;  %v132_v21 = vsub.f32 0.0, %v128_v18 }
  0xfb   :  { %212 = vpow2.f32 %v133_v20  ;;  %v135_v22 = vmul.f32 1.442695, %v132_v21 }
  0xfd   :  { %214 = vpow2.f32 %v135_v22 }
 0x105   :  { %v213_v23 = vpop.eup %212 }
 0x106   :  { %v137_v24 = vadd.f32 1.0, %v213_v23 }
 0x107   :  { %v215_v25 = vpop.eup %214 }
 0x108   :  { %216 = vrcp.f32 %v137_v24  ;;  %v138_v26 = vadd.f32 1.0, %v215_v25 }
 0x10a   :  { %218 = vrcp.f32 %v138_v26 }
 0x112   :  { %v217_v27 = vpop.eup %216 }
 0x113   :  { %v141_v28 = vmul.f32 %v217_v27, %v16_v9 }
 0x114   :  { %v219_v29 = vpop.eup %218 }
 0x115   :  { %v142_v30 = vmul.f32 %v219_v29, %v17_v10  ;;  %143 = vst [vmem:[#allocation2] sm:$0xff] %v141_v28 }
 0x117   :  { %144 = vst [vmem:[#allocation2 + $0x8] sm:$0xff] %v142_v30 }
 0x118   :  { %231 = shalt.err (!%p228_p4)
}
 0x119   :  { %s232_s9 = scalar_lea.hbm %s317_s3, 256 }
 0x11a   :  { %p233_p5 = scmp.ne.s32.totalorder %s317_s3, %s232_s9  ;;  %p236_p6 = scmp.lt.u32.totalorder %s232_s9, %s317_s3 }
 0x11c   :  { %p238_p7 = pnand %p236_p6, %p233_p5 }
 0x11e   :  { %241 = shalt.err (!%p238_p7)
}
 0x11f   :  { %s247_s14 = smov 128   ;;  %s248_s15 = smov 8  }
 0x120   :  { %156 = dma.vmem_to_hbm [thread:$0]  %s151_s1, 256, %s317_s3, [#allocation3], %s247_s14, %s247_s14, %s248_s15  }
 0x121   :  { %242 = dma.done.wait [#allocation3], 256  }
 0x122   :  { %243 = vsyncadd [#allocation3], 4294967040 }
 0x123   :  { %160 = vsyncpa [#allocation3], 1 }

</bundles_post_ra>
